<compile_context>
chip_gen: v7x
topology: tpu7x:2x2x1
jax: 0.10.0
libtpu: 0.0.40
codegen_flags: <defaults>
</compile_context>

<pallas_src>
import functools

import jax
import jax.numpy as jnp
from jax.experimental import pallas as pl
from jax.experimental.pallas import tpu as pltpu

_MB = 1024 * 1024
_LANE = 128
_SUBLANE = 8


def _round_up(v, m):
    return (v + m - 1) // m * m


def _cdiv(a, b):
    return -(-a // b)


def _vmem_limit_bytes():
    """Scoped-VMEM limit tuned per generation: v5e/v6e (128 MiB physical) get a
    64 MiB limit so big row tiles survive; v7x (64 MiB per TC) keeps 32 MiB."""
    cap = 64 * _MB
    try:
        info = pltpu.get_tpu_info()
        cap = int(getattr(info, "vmem_capacity_bytes", cap) or cap)
    except Exception:
        pass
    return 64 * _MB if cap >= 128 * _MB else 32 * _MB


def _pick_tile(per_row_bytes, fixed_bytes, budget_bytes, max_tile):
    """Largest row tile whose (double-buffered) working set fits the budget."""
    for t in (max_tile, 1024, 512, 256, 128, 64, 32, 16, 8):
        if t > max_tile or t < _SUBLANE:
            continue
        if fixed_bytes + t * per_row_bytes <= budget_bytes:
            return t
    return _SUBLANE


def _gcn_prep_kernel(adj_ref, d_ref, lap_ref, *, tile_n):
    """Row tile: d = rsqrt(rowsum(adj) + 1);  lap = d * (adj + I)  in bf16."""
    adj = adj_ref[...].astype(jnp.float32)                 # (TN, N), native-dtype read
    deg = jnp.sum(adj, axis=1, keepdims=True) + 1.0        # +1 = identity's degree
    d = jax.lax.rsqrt(deg)                                 # (TN, 1)
    d_ref[...] = d

    # Fold the identity and the row-side normalization into the bf16 operand
    # that pass 2 streams:  lap[i, j] = d_i * (adj[i, j] + [i == j]).
    row0 = pl.program_id(1) * tile_n
    rows = jax.lax.broadcasted_iota(jnp.int32, adj.shape, 0) + row0
    cols = jax.lax.broadcasted_iota(jnp.int32, adj.shape, 1)
    eye_d = jnp.where(rows == cols, d, 0.0)
    lap_ref[...] = (d * adj + eye_d).astype(lap_ref.dtype)


def _gcn_matmul_kernel(lap_ref, z_ref, out_ref):
    """Row tile: out = relu(lap @ z)   (bf16 MXU operands, f32 accumulation)."""
    h = jnp.dot(lap_ref[...], z_ref[...], preferred_element_type=jnp.float32)
    out_ref[...] = jnp.maximum(h, 0.0).astype(out_ref.dtype)


def dense_gcn(x, adj, w, *, tile_rows=None):
    """x: [B, N, Cin], adj: [B, N, N], w: [Cin, Cout] -> [B, N, Cout]."""
    B, N, Cin = x.shape
    Cout = w.shape[1]
    out_dtype = jnp.result_type(x.dtype, w.dtype)
    cout_p = _round_up(Cout, _LANE)            # lane-dense output stores
    n_lane = _round_up(N, _LANE)               # VMEM lane footprint of one adj row

    vmem_limit = _vmem_limit_bytes()
    budget = vmem_limit - 6 * _MB              # headroom for internal scratch

    max_tile = _round_up(N, _SUBLANE)
    if B == 1 and N > _SUBLANE:
        # Guarantee >= 2 parallel grid steps so both TCs on dual-core chips work.
        max_tile = min(max_tile, max(_SUBLANE, _round_up(_cdiv(N, 2), _SUBLANE)))

    # Pass-1 tile: double-buffered adj input + bf16 lap output + d output,
    # plus a conservative allowance for in-kernel f32/i32 elementwise temps.
    adj_itemsize = jnp.dtype(adj.dtype).itemsize
    per_row1 = (2 * n_lane * adj_itemsize + 2 * n_lane * 2 + 2 * _LANE * 4
                + 3 * n_lane * 4)
    tile1 = _pick_tile(per_row1, 0, budget, max_tile)

    # Pass-2 tile: double-buffered bf16 lap tile + f32 out tile + resident z slab.
    z_vmem = _round_up(N, 16) * cout_p * 2
    z_bufs = 1 if 2 * z_vmem > 8 * _MB else 2  # single-buffer the big resident slab
    per_row2 = 2 * n_lane * 2 + 2 * cout_p * 4
    tile2 = _pick_tile(per_row2, z_bufs * z_vmem, budget, max_tile)

    if tile_rows is not None:
        t = max(_SUBLANE, _round_up(min(int(tile_rows), max_tile), _SUBLANE))
        tile1 = tile2 = t

    rt1 = _cdiv(N, tile1)
    rt2 = _cdiv(N, tile2)

    compiler_params = pltpu.CompilerParams(
        dimension_semantics=("parallel", "parallel"),
        vmem_limit_bytes=vmem_limit)

    # ---- Pass 1: degrees + bf16 row-normalized Laplacian (one pass over adj). --
    prep_cost = pl.CostEstimate(
        flops=int(4 * B * N * N),
        transcendentals=int(B * N),
        bytes_accessed=int(B * N * N * (adj_itemsize + 2) + B * N * 4))

    d, lap = pl.pallas_call(
        functools.partial(_gcn_prep_kernel, tile_n=tile1),
        out_shape=(jax.ShapeDtypeStruct((B, N, 1), jnp.float32),
                   jax.ShapeDtypeStruct((B, N, N), jnp.bfloat16)),
        grid_spec=pltpu.PrefetchScalarGridSpec(
            num_scalar_prefetch=0,
            grid=(B, rt1),
            in_specs=[
                pl.BlockSpec((pl.Squeezed(), tile1, N), lambda b, i: (b, i, 0)),
            ],
            out_specs=[
                pl.BlockSpec((pl.Squeezed(), tile1, 1), lambda b, i: (b, i, 0)),
                pl.BlockSpec((pl.Squeezed(), tile1, N), lambda b, i: (b, i, 0)),
            ],
        ),
        compiler_params=compiler_params,
        cost_estimate=prep_cost,
    )(adj)

    # ---- Tiny XLA step: z = d * (x @ W) in bf16, feature dim padded to 128. ----
    xw = jnp.einsum("bnc,co->bno", x.astype(jnp.float32), w.astype(jnp.float32),
                    precision=jax.lax.Precision.HIGHEST)
    z = (d * xw).astype(jnp.bfloat16)
    if cout_p != Cout:
        z = jnp.pad(z, ((0, 0), (0, 0), (0, cout_p - Cout)))

    # ---- Pass 2: out = relu(lap @ z), the heavy bf16 MXU pass. ------------------
    z_spec_kwargs = {}
    if z_bufs == 1:
        # Large resident slab: drop its double buffer (one short stall per batch).
        z_spec_kwargs["pipeline_mode"] = pl.Buffered(1)

    mm_cost = pl.CostEstimate(
        flops=int(2 * B * N * N * cout_p),
        transcendentals=0,
        bytes_accessed=int(B * N * N * 2 + B * N * cout_p * 2
                           + B * N * cout_p * jnp.dtype(out_dtype).itemsize))

    out_p = pl.pallas_call(
        _gcn_matmul_kernel,
        out_shape=jax.ShapeDtypeStruct((B, N, cout_p), out_dtype),
        grid_spec=pltpu.PrefetchScalarGridSpec(
            num_scalar_prefetch=0,
            grid=(B, rt2),
            in_specs=[
                pl.BlockSpec((pl.Squeezed(), tile2, N), lambda b, i: (b, i, 0)),
                pl.BlockSpec((pl.Squeezed(), N, cout_p), lambda b, i: (b, 0, 0),
                             **z_spec_kwargs),
            ],
            out_specs=pl.BlockSpec((pl.Squeezed(), tile2, cout_p),
                                   lambda b, i: (b, i, 0)),
        ),
        compiler_params=compiler_params,
        cost_estimate=mm_cost,
    )(lap, z)

    return out_p if cout_p == Cout else out_p[:, :, :Cout]


def dense_gcn_ref(x, adj, w):
    """Pure-JAX f32 reference mirroring the PyTorch forward."""
    n = adj.shape[1]
    adj = adj + jnp.eye(n, dtype=adj.dtype)[None]
    degree = jnp.sum(adj, axis=2)
    d = 1.0 / jnp.sqrt(degree)
    lap = d[:, :, None] * adj * d[:, None, :]
    h = jnp.matmul(lap, x)
    return jax.nn.relu(jnp.matmul(h, w))


if __name__ == "__main__":
    key = jax.random.PRNGKey(0)
    k_case1, k_case2 = jax.random.split(key, 2)

    def make_inputs(k, B, N, Cin, Cout):
        kx, ka, kw = jax.random.split(k, 3)
        x = jax.random.normal(kx, (B, N, Cin), dtype=jnp.float32)
        a = jax.random.uniform(ka, (B, N, N), dtype=jnp.float32)
        adj = (a + jnp.swapaxes(a, 1, 2)) * 0.5        # symmetric, non-negative
        w = jax.random.normal(kw, (Cin, Cout), dtype=jnp.float32)  # torch.randn-style
        return x, adj, w

    # Case 1: aligned shapes; Cout=64 exercises the pad-to-128 lane-dense path.
    x, adj, w = make_inputs(k_case1, 2, 256, 16, 64)
    out = jax.block_until_ready(dense_gcn(x, adj, w))
    ref = dense_gcn_ref(x, adj, w)
    assert out.shape == ref.shape
    assert jnp.allclose(out, ref, atol=2e-2, rtol=2e-2), "mismatch (aligned case)"

    # Case 2: B=1 (dual-core grid-step cap) with a ragged row tail (N=200 ->
    # 104+96 row tiles); no padded copy of adj is ever materialized.
    x2, adj2, w2 = make_inputs(k_case2, 1, 200, 16, 64)
    out2 = jax.block_until_ready(dense_gcn(x2, adj2, w2))
    ref2 = dense_gcn_ref(x2, adj2, w2)
    assert out2.shape == ref2.shape
    assert jnp.allclose(out2, ref2, atol=2e-2, rtol=2e-2), "mismatch (ragged case)"

    print("KERNEL_OK")
</pallas_src>

<mosaic_0001>
module attributes {stable_mosaic.version = 11 : i64} {
  func.func @_gcn_prep_kernel(%arg0: i32, %arg1: i32, %arg2: memref<1x256x256xf32, #tpu.memory_space<vmem>>, %arg3: memref<1x256x1xf32, #tpu.memory_space<vmem>>, %arg4: memref<1x256x256xbf16, #tpu.memory_space<vmem>>) attributes {dimension_semantics = [#tpu.dimension_semantics<parallel>, #tpu.dimension_semantics<parallel>], iteration_bounds = array<i64: 2, 1>, scalar_prefetch = 0 : i64, scratch_operands = 0 : i64, tpu.core_type = #tpu.core_type<tc>, window_params = [{transform_indices = @transform_0, window_bounds = array<i64: 1, 256, 256>}, {transform_indices = @transform_1, window_bounds = array<i64: 1, 256, 1>}, {transform_indices = @transform_2, window_bounds = array<i64: 1, 256, 256>}]} {
    %c0 = arith.constant 0 : index
    %c0_0 = arith.constant 0 : index
    %c0_1 = arith.constant 0 : index
    %0 = vector.load %arg2[%c0, %c0_0, %c0_1] : memref<1x256x256xf32, #tpu.memory_space<vmem>>, vector<1x256x256xf32>
    %1 = vector.shape_cast %0 : vector<1x256x256xf32> to vector<256x256xf32>
    %cst = arith.constant dense<0.000000e+00> : vector<256xf32>
    %2 = vector.multi_reduction <add>, %1, %cst [1] : vector<256x256xf32> to vector<256xf32>
    %3 = vector.shape_cast %2 : vector<256xf32> to vector<256x1xf32>
    %cst_2 = arith.constant 1.000000e+00 : f32
    %4 = vector.broadcast %cst_2 : f32 to vector<256x1xf32>
    %5 = arith.addf %3, %4 : vector<256x1xf32>
    %6 = math.rsqrt %5 : vector<256x1xf32>
    %c0_3 = arith.constant 0 : index
    %c0_4 = arith.constant 0 : index
    %c0_5 = arith.constant 0 : index
    %7 = vector.load %arg3[%c0_3, %c0_4, %c0_5] : memref<1x256x1xf32, #tpu.memory_space<vmem>>, vector<1x256x1xf32>
    %8 = vector.shape_cast %7 : vector<1x256x1xf32> to vector<256x1xf32>
    %9 = vector.shape_cast %6 : vector<256x1xf32> to vector<1x256x1xf32>
    tpu.vector_store %arg3[%c0_3, %c0_4, %c0_5], %9 {strides = array<i32>} : memref<1x256x1xf32, #tpu.memory_space<vmem>>, vector<1x256x1xf32>,
    %c256_i32 = arith.constant 256 : i32
    %10 = arith.muli %arg1, %c256_i32 : i32
    %11 = tpu.iota {dimensions = array<i32: 0>} : vector<256x256xi32>
    %12 = vector.broadcast %10 : i32 to vector<256x256xi32>
    %13 = arith.addi %11, %12 : vector<256x256xi32>
    %14 = tpu.iota {dimensions = array<i32: 1>} : vector<256x256xi32>
    %15 = arith.cmpi eq, %13, %14 : vector<256x256xi32>
    %cst_6 = arith.constant 0.000000e+00 : f32
    %16 = vector.shape_cast %6 : vector<256x1xf32> to vector<256x1xf32>
    %17 = vector.broadcast %16 : vector<256x1xf32> to vector<256x256xf32>
    %18 = vector.broadcast %cst_6 : f32 to vector<256x256xf32>
    %19 = arith.select %15, %17, %18 : vector<256x256xi1>, vector<256x256xf32>
    %20 = vector.broadcast %6 : vector<256x1xf32> to vector<256x256xf32>
    %21 = arith.mulf %20, %1 : vector<256x256xf32>
    %22 = arith.addf %21, %19 : vector<256x256xf32>
    %23 = arith.truncf %22 : vector<256x256xf32> to vector<256x256xbf16>
    %c0_7 = arith.constant 0 : index
    %c0_8 = arith.constant 0 : index
    %c0_9 = arith.constant 0 : index
    %24 = vector.load %arg4[%c0_7, %c0_8, %c0_9] : memref<1x256x256xbf16, #tpu.memory_space<vmem>>, vector<1x256x256xbf16>
    %25 = vector.shape_cast %24 : vector<1x256x256xbf16> to vector<256x256xbf16>
    %26 = vector.shape_cast %23 : vector<256x256xbf16> to vector<1x256x256xbf16>
    tpu.vector_store %arg4[%c0_7, %c0_8, %c0_9], %26 {strides = array<i32>} : memref<1x256x256xbf16, #tpu.memory_space<vmem>>, vector<1x256x256xbf16>,
    return
  }
  func.func @transform_0(%arg0: i32, %arg1: i32) -> (i32, i32, i32) {
    %c0_i32 = arith.constant 0 : i32
    %c0_i32_0 = arith.constant 0 : i32
    return %arg0, %arg1, %c0_i32 : i32, i32, i32
  }
  func.func @transform_1(%arg0: i32, %arg1: i32) -> (i32, i32, i32) {
    %c0_i32 = arith.constant 0 : i32
    %c0_i32_0 = arith.constant 0 : i32
    return %arg0, %arg1, %c0_i32 : i32, i32, i32
  }
  func.func @transform_2(%arg0: i32, %arg1: i32) -> (i32, i32, i32) {
    %c0_i32 = arith.constant 0 : i32
    %c0_i32_0 = arith.constant 0 : i32
    return %arg0, %arg1, %c0_i32 : i32, i32, i32
  }
}

</mosaic_0001>

<bundles_post_ra>
// kernel: tpu_custom_call.1
= control target key start
LH: loop header
LB: loop body
LE: loop exit
PB: predicated region body
PF: predicated region fallthrough
CT: control target
= control target key end

     0   :  { %8 = vsyncpa [#allocation3], 0  ;;  %s2347_s0 = inlined_call_operand.hbm [shape: f32[2,256,256], index: 0, kind: input, shape index: {}]   ;;  %s2348_s1 = inlined_call_operand.vmem [shape: f32[2,256,1], index: 1, kind: output, shape index: {0}]   ;;  %s2349_s2 = inlined_call_operand.hbm [shape: bf16[2,256,256], index: 2, kind: output, shape index: {1}]  }
   0x1   :  { %10 = vsyncpa [#allocation3 + $0x1], 0 }
   0x2   :  { %11 = vsyncpa [#allocation4], 0 }
   0x3   :  { %13 = vsyncpa [#allocation4 + $0x1], 0  ;;  %s1517_s9 = smov 0   ;;  %s1519_s10 = smov 0  }
   0x4   :  { %s1521_s11 = smov 0   ;;  %s1523_s12 = smov 0  }
   0x5   :  { %s1525_s13 = smov 0   ;;  %s1527_s14 = smov 0  }
   0x6 LB: > { %s1168_s15 = sadd.s32 4294967295, %s1494_s14   ;;  %s1169_s16 = sadd.s32 4294967294, %s1494_s14   ;;  %s1494_s14 = sphi %s1527_s14, %s19_s14   ;;  %s1490_s13 = sphi %s1525_s13, %s2436_s13   ;;  %s1486_s12 = sphi %s1523_s12, %s2435_s12   ;;  %s1482_s11 = sphi %s1521_s11, %s2434_s11   ;;  %s1478_s10 = sphi %s1519_s10, %s2433_s10   ;;  %s1474_s9 = sphi %s1517_s9, %s2432_s9  }
   0x7   : > { %s31_s17 = sadd.s32 1, %s1490_s13  ;;  %s40_s18 = sadd.s32 1, %s1482_s11 }
   0x8   : > { %p33_p0 = scmp.ge.s32.totalorder %s31_s17, 2  ;;  %p47_p1 = scmp.ne.s32.totalorder %s1482_s11, %s1478_s10 }
   0x9   : > { %p48_p2 = scmp.eq.s32.totalorder %s1494_s14, 0  ;;  %p53_p3 = scmp.ne.s32.totalorder %s1478_s10, %s1474_s9 }
   0xa   : > { %s2438_s17 = smov (%p33_p0, %s31_s17), 0  ;;  %p54_p5 = scmp.eq.s32.totalorder %s1168_s15, 0 }
   0xb   : > { %p1558_p4 = por %p48_p2, %p47_p1  ;;  %s35_s20 = ssub.s32 %s1490_s13, %s2438_s17 }
   0xc   : > { %p107_p6 = scmp.eq.s32.totalorder %s1168_s15, 1  ;;  %p38_p7 = scmp.eq.s32.totalorder %s35_s20, 0 }
   0xd   : > { %p1564_p8 = por %p54_p5, %p53_p3  ;;  %p113_p10 = scmp.eq.s32.totalorder %s1169_s16, 1 }
   0xe   : > { %p1568_p9 = por %p107_p6, %p47_p1  ;;  %p1264_p13 = scmp.lt.s32.totalorder %s1494_s14, 2 }
   0xf   : > { %s1573_s23 = scalar_select %p38_p7, %s1482_s11, %s40_s18  }
  0x10   : > { %s2377_s22 = scalar_select %p1568_p9, 1, 0 }
  0x11   : > { %p1575_p11 = por %p113_p10, %p53_p3  ;;  %s133_s25 = sand.u32 1, %s1482_s11  }
  0x12   : > { %s1172_s26 = sshll.u32 %s133_s25, 9  ;;  %s1217_s27 = sshll.u32 %s1490_s13, 13 }
  0x13   : > { %s2378_s24 = scalar_select %p1575_p11, 1, 0 }
  0x14   : > { %s1586_s30 = scalar_lea.hbm %s2347_s0, %s1217_s27  ;;  %s137_s3 = scalar_lea.vmem [#allocation2], %s1172_s26 }
  0x15   : > { %s147_s4 = sshll.u32 %s137_s3, 4  ;;  %p1592_p0 = pnand %p1264_p13, %p1558_p4  ;;  %s1588_s4 = int_to_ptr.vmem [resolvable:$true] %s147_s4 }
  0x16   : > { %s1597_s6 = scalar_lea.sflag [#allocation3], %s133_s25  ;;  %s1382_s7 = scalar_lea.hbm %s1586_s30, 8192 }
  0x17   : > { %p1383_p2 = scmp.ne.s32.totalorder %s1586_s30, %s1382_s7  ;;  %p1384_p3 = pneg %p1592_p0 }
  0x18   : > { %s1387_s16 = scalar_lea.hbm %s2347_s0, 16384  ;;  %p1388_p4 = scmp.lt.u32.totalorder %s1586_s30, %s2347_s0 }
  0x19   : > { %p1385_p5 = pnand %p1384_p3, %p1383_p2  ;;  %p1389_p7 = scmp.lt.u32.totalorder %s1387_s16, %s1382_s7 }
  0x1a   : > { %p1391_p13 = scmp.lt.u32.totalorder %s1382_s7, %s1586_s30 }
  0x1b   : > { %p1386_p6 = pneg %p1385_p5  ;;  %p1390_p10 = por %p1389_p7, %p1388_p4 }
  0x1d   : > { %p1392_p12 = por %p1391_p13, %p1390_p10 }
  0x1f   : > { %p1393_p1 = pnand %p1392_p12, %p1386_p6 }
  0x21   : > { %1396 = shalt.err (!%p1393_p1)
}
  0x22   : > { %s1397_s20 = scalar_lea.vmem %s1588_s4, 8192  ;;  %s1496_s25 = smov [#allocation2]  }
  0x23   : > { %p1398_p2 = scmp.ne.s32.totalorder %s1588_s4, %s1397_s20  ;;  %s1402_s26 = sshll.u32 %s1496_s25, 4  ;;  %s1403_s26 = int_to_ptr.vmem [resolvable:$false] %s1402_s26 }
  0x24   : > { %s1404_s27 = scalar_lea.vmem %s1403_s26, 16384  ;;  %p1405_p9 = scmp.lt.s32.totalorder %s1588_s4, %s1403_s26 }
  0x25   : > { %p1400_p5 = pnand %p1398_p2, %p1384_p3  ;;  %p1406_p4 = scmp.lt.s32.totalorder %s1404_s27, %s1397_s20 }
  0x27   : > { %p1401_p11 = pneg %p1400_p5  ;;  %p1407_p7 = por %p1406_p4, %p1405_p9 }
  0x29   : > { %p1408_p10 = pnand %p1407_p7, %p1401_p11 }
  0x2b   : > { %1411 = shalt.err (!%p1408_p10)
}
  0x2c   : > { %s1497_s28 = smov 256   ;;  %s1498_s29 = smov 16  }
  0x2d   : > { %1259 = dma.hbm_to_vmem [thread:$0]  (!%p1592_p0), %s1586_s30, 8192, %s1588_s4, %s1597_s6, %s1497_s28, %s1497_s28, %s1498_s29  }
  0x2e   : > { %p155_p12 = scmp.lt.s32.totalorder %s1494_s14, 3  ;;  %p2380_p1 = scmp.ge.s32.totalorder %s1494_s14, 1 }
  0x30   : > { %p156_p3 = pnand %p2380_p1, %p155_p12 }
  0x32   : > { %159 = sbr.rel (%p156_p3) target bundleno = 308 (0x134), region = 24 }
  0x39   : > { %s1629_s3 = sand.u32 1, %s1478_s10  }
  0x3a   : > { %s1176_s7 = sshll.u32 %s1629_s3, 9  ;;  %s162_s8 = scalar_lea.sflag [#allocation3], %s1629_s3 }
  0x3b   : > { %s1633_s15 = scalar_lea.vmem [#allocation2], %s1176_s7 }
  0x3c   : > { %1465 = dma.done.wait (%p1564_p8), %s162_s8, 8192  }
  0x3d   : > { %1467 = vsyncadd (%p1564_p8), %s162_s8, 4294959104  ;;  %v1640_v0 = vld [vmem:[%s1633_s15 + $0x20] sm:$0xff]  ;;  %v1643_v1 = vld [vmem:[%s1633_s15 + $0x28] sm:$0xff]  ;;  %p197_p8 = scmp.lt.s32.totalorder %s1486_s12, 1  ;;  %vm431_vm0 = vcmask 7168   ;;  %s1177_s16 = sshll.u32 %s1629_s3, 8 }
  0x3e   : > { %v1646_v2 = vld [vmem:[%s1633_s15] sm:$0xff]  ;;  %v277_v3 = vadd.f32 %v1643_v1, %v1640_v0  ;;  %v1651_v4 = vld [vmem:[%s1633_s15 + $0x8] sm:$0xff]  ;;  %v1654_v5 = vld [vmem:[%s1633_s15 + $0x30] sm:$0xff]  ;;  %s1966_s18 = scalar_lea.vmem [#allocation5], %s1177_s16  ;;  %s1251_s19 = sshll.u32 %s1486_s12, 12 }
  0x3f   : > { %v1657_v6 = vld [vmem:[%s1633_s15 + $0x38] sm:$0xff]  ;;  %v271_v7 = vadd.f32 %v1651_v4, %v1646_v2  ;;  %v1662_v8 = vld [vmem:[%s1633_s15 + $0x10] sm:$0xff]  ;;  %v1678_v14 = vld [vmem:[%s1633_s15 + $0x40] sm:$0xff]  ;;  %s198_s21 = scalar_select %p197_p8, %s1486_s12, 1 }
  0x40   : > { %v1665_v9 = vld [vmem:[%s1633_s15 + $0x18] sm:$0xff]  ;;  %278 = vadd.xlane.f32.xlu1 %v277_v3  ;;  %v280_v10 = vadd.f32 %v1657_v6, %v1654_v5  ;;  %v1672_v12 = vld [vmem:[%s1633_s15 + $0x50] sm:$0xff]  ;;  %v1681_v15 = vld [vmem:[%s1633_s15 + $0x48] sm:$0xff]  ;;  %s1044_s20 = sshll.u32 %s1966_s18, 4  ;;  %s2295_s27 = scalar_lea.hbm %s2349_s2, %s1251_s19  ;;  %s2297_s20 = int_to_ptr.vmem [resolvable:$true] %s1044_s20 }
  0x41   : > { %272 = vadd.xlane.f32.xlu0 %v271_v7  ;;  %v274_v11 = vadd.f32 %v1665_v9, %v1662_v8  ;;  %v1675_v13 = vld [vmem:[%s1633_s15 + $0x58] sm:$0xff]  ;;  %v283_v17 = vadd.f32 %v1681_v15, %v1678_v14  ;;  %v1688_v18 = vld [vmem:[%s1633_s15 + $0x70] sm:$0xff]  ;;  %v1694_v20 = vld [vmem:[%s1633_s15 + $0x60] sm:$0xff]  ;;  %s1218_s30 = sshll.u32 %s198_s21, 8  ;;  %s1024_s12 = scalar_lea.sflag [#allocation4], %s1629_s3 }
  0x42   : > { %v286_v16 = vadd.f32 %v1675_v13, %v1672_v12  ;;  %v1691_v19 = vld [vmem:[%s1633_s15 + $0x78] sm:$0xff]  ;;  %v1697_v21 = vld [vmem:[%s1633_s15 + $0x68] sm:$0xff]  ;;  %v1704_v24 = vld [vmem:[%s1633_s15 + $0x90] sm:$0xff]  ;;  %s1910_s6 = scalar_lea.vmem %s2348_s1, %s1218_s30  ;;  %s1412_s28 = scalar_lea.vmem %s2297_s20, 4096 }
  0x43   : > { %v292_v22 = vadd.f32 %v1691_v19, %v1688_v18  ;;  %v289_v23 = vadd.f32 %v1697_v21, %v1694_v20  ;;  %v1707_v25 = vld [vmem:[%s1633_s15 + $0x98] sm:$0xff]  ;;  %v1710_v26 = vld [vmem:[%s1633_s15 + $0x80] sm:$0xff]  ;;  %v1713_v27 = vld [vmem:[%s1633_s15 + $0x88] sm:$0xff]  ;;  %p1413_p9 = scmp.ne.s32.totalorder %s2297_s20, %s1412_s28  ;;  %p2429_p11 = scmp.ne.s32.totalorder %s2377_s22, 0 }
  0x44   : > { %281 = vadd.xlane.f32.xlu1 %v280_v10  ;;  %v298_v28 = vadd.f32 %v1707_v25, %v1704_v24  ;;  %v295_v29 = vadd.f32 %v1713_v27, %v1710_v26  ;;  %v1720_v30 = vld [vmem:[%s1633_s15 + $0xb0] sm:$0xff]  ;;  %v1723_v31 = vld [vmem:[%s1633_s15 + $0xb8] sm:$0xff]  ;;  %v1726_v32 = vld [vmem:[%s1633_s15 + $0xa0] sm:$0xff]  ;;  %s1499_s29 = smov [#allocation5]  }
  0x45   : > { %275 = vadd.xlane.f32.xlu0 %v274_v11  ;;  %v1729_v33 = vld [vmem:[%s1633_s15 + $0xa8] sm:$0xff]  ;;  %v304_v34 = vadd.f32 %v1723_v31, %v1720_v30  ;;  %v1736_v36 = vld [vmem:[%s1633_s15 + $0xd0] sm:$0xff]  ;;  %v1739_v37 = vld [vmem:[%s1633_s15 + $0xd8] sm:$0xff]  ;;  %p1414_p0 = pnand %p1413_p9, %p2429_p11  ;;  %s1416_s7 = sshll.u32 %s1499_s29, 4  ;;  %s1417_s7 = int_to_ptr.vmem [resolvable:$false] %s1416_s7 }
  0x46   : > { %v301_v35 = vadd.f32 %v1729_v33, %v1726_v32  ;;  %v1742_v38 = vld [vmem:[%s1633_s15 + $0xc0] sm:$0xff]  ;;  %v1745_v39 = vld [vmem:[%s1633_s15 + $0xc8] sm:$0xff]  ;;  %v310_v40 = vadd.f32 %v1739_v37, %v1736_v36  ;;  %v1752_v42 = vld [vmem:[%s1633_s15 + $0xf0] sm:$0xff]  ;;  %s1418_s8 = scalar_lea.vmem %s1417_s7, 8192  ;;  %p1419_p13 = scmp.lt.s32.totalorder %s2297_s20, %s1417_s7 }
  0x47   : > { %v307_v41 = vadd.f32 %v1745_v39, %v1742_v38  ;;  %v1755_v43 = vld [vmem:[%s1633_s15 + $0xf8] sm:$0xff]  ;;  %v1758_v44 = vld [vmem:[%s1633_s15 + $0xe0] sm:$0xff]  ;;  %v1761_v45 = vld [vmem:[%s1633_s15 + $0xe8] sm:$0xff]  ;;  %p1415_p6 = pneg %p1414_p0  ;;  %p1420_p2 = scmp.lt.s32.totalorder %s1418_s8, %s1412_s28 }
  0x48   : > { %287 = vadd.xlane.f32.xlu1 %v286_v16  ;;  %v316_v46 = vadd.f32 %v1755_v43, %v1752_v42  ;;  %v313_v47 = vadd.f32 %v1761_v45, %v1758_v44  ;;  %v1768_v48 = vld [vmem:[%s1633_s15 + $0x110] sm:$0xff]  ;;  %v1771_v49 = vld [vmem:[%s1633_s15 + $0x118] sm:$0xff]  ;;  %v1774_v50 = vld [vmem:[%s1633_s15 + $0x100] sm:$0xff] }
  0x49   : > { %284 = vadd.xlane.f32.xlu0 %v283_v17  ;;  %v1777_v51 = vld [vmem:[%s1633_s15 + $0x108] sm:$0xff]  ;;  %v322_v52 = vadd.f32 %v1771_v49, %v1768_v48  ;;  %v1784_v54 = vld [vmem:[%s1633_s15 + $0x130] sm:$0xff]  ;;  %v1787_v55 = vld [vmem:[%s1633_s15 + $0x138] sm:$0xff]  ;;  %p1421_p5 = por %p1420_p2, %p1419_p13 }
  0x4a   : > { %v319_v53 = vadd.f32 %v1777_v51, %v1774_v50  ;;  %v1790_v56 = vld [vmem:[%s1633_s15 + $0x120] sm:$0xff]  ;;  %v1793_v57 = vld [vmem:[%s1633_s15 + $0x128] sm:$0xff]  ;;  %v328_v58 = vadd.f32 %v1787_v55, %v1784_v54  ;;  %v1800_v60 = vld [vmem:[%s1633_s15 + $0x150] sm:$0xff] }
  0x4b   : > { %2381 = vst [vmem:[#allocation8_spill] sm:$0xff] %v1790_v56  ;;  %v325_v59 = vadd.f32 %v1793_v57, %v1790_v56  ;;  %2382 = vst [vmem:[#allocation9_spill] sm:$0xff] %v1800_v60  ;;  %v1803_v61 = vld [vmem:[%s1633_s15 + $0x158] sm:$0xff]  ;;  %v1806_v62 = vld [vmem:[%s1633_s15 + $0x140] sm:$0xff]  ;;  %p1422_p4 = pnand %p1421_p5, %p1415_p6 }
  0x4c   : > { %293 = vadd.xlane.f32.xlu1 %v292_v22  ;;  %2383 = vst [vmem:[#allocation10_spill] sm:$0xff] %v1806_v62  ;;  %v1809_v63 = vld [vmem:[%s1633_s15 + $0x148] sm:$0xff]  ;;  %v334_v3 = vadd.f32 %v1803_v61, %v1800_v60  ;;  %v1816_v10 = vld [vmem:[%s1633_s15 + $0x170] sm:$0xff]  ;;  %v1819_v11 = vld [vmem:[%s1633_s15 + $0x178] sm:$0xff] }
  0x4d   : > { %290 = vadd.xlane.f32.xlu0 %v289_v23  ;;  %2384 = vst [vmem:[#allocation11_spill] sm:$0xff] %v1809_v63  ;;  %v331_v7 = vadd.f32 %v1809_v63, %v1806_v62  ;;  %2385 = vst [vmem:[#allocation12_spill] sm:$0xff] %v1816_v10  ;;  %v1822_v16 = vld [vmem:[%s1633_s15 + $0x160] sm:$0xff]  ;;  %v1825_v17 = vld [vmem:[%s1633_s15 + $0x168] sm:$0xff]  ;;  %v340_v22 = vadd.f32 %v1819_v11, %v1816_v10 }
  0x4e   : > { %2386 = vst [vmem:[#allocation13_spill] sm:$0xff] %v1819_v11  ;;  %2387 = vst [vmem:[#allocation14_spill] sm:$0xff] %v1822_v16  ;;  %v337_v23 = vadd.f32 %v1825_v17, %v1822_v16 }
  0x4f   : > { %2388 = vst [vmem:[#allocation15_spill] sm:$0xff] %v1825_v17 }
  0x50   : > { %299 = vadd.xlane.f32.xlu1 %v298_v28  ;;  %v1832_v28 = vld [vmem:[%s1633_s15 + $0x190] sm:$0xff] }
  0x51   : > { %296 = vadd.xlane.f32.xlu0 %v295_v29  ;;  %2389 = vst [vmem:[#allocation16_spill] sm:$0xff] %v1832_v28  ;;  %v1835_v29 = vld [vmem:[%s1633_s15 + $0x198] sm:$0xff] }
  0x52   : > { %2390 = vst [vmem:[#allocation17_spill] sm:$0xff] %v1835_v29 }
  0x54   : > { %305 = vadd.xlane.f32.xlu1 %v304_v34  ;;  %v1838_v34 = vld [vmem:[%s1633_s15 + $0x180] sm:$0xff] }
  0x55   : > { %302 = vadd.xlane.f32.xlu0 %v301_v35  ;;  %2391 = vst [vmem:[#allocation18_spill] sm:$0xff] %v1838_v34  ;;  %v1841_v35 = vld [vmem:[%s1633_s15 + $0x188] sm:$0xff] }
  0x56   : > { %2392 = vst [vmem:[#allocation19_spill] sm:$0xff] %v1841_v35 }
  0x58   : > { %311 = vadd.xlane.f32.xlu1 %v310_v40  ;;  %v346_v40 = vadd.f32 %v1835_v29, %v1832_v28 }
  0x59   : > { %308 = vadd.xlane.f32.xlu0 %v307_v41  ;;  %v343_v41 = vadd.f32 %v1841_v35, %v1838_v34 }
  0x5c   : > { %317 = vadd.xlane.f32.xlu1 %v316_v46  ;;  %v1848_v46 = vld [vmem:[%s1633_s15 + $0x1b0] sm:$0xff] }
  0x5d   : > { %314 = vadd.xlane.f32.xlu0 %v313_v47  ;;  %2393 = vst [vmem:[#allocation20_spill] sm:$0xff] %v1848_v46  ;;  %v1851_v47 = vld [vmem:[%s1633_s15 + $0x1b8] sm:$0xff] }
  0x5e   : > { %2394 = vst [vmem:[#allocation21_spill] sm:$0xff] %v1851_v47 }
  0x60   : > { %323 = vadd.xlane.f32.xlu1 %v322_v52  ;;  %v1854_v52 = vld [vmem:[%s1633_s15 + $0x1a0] sm:$0xff] }
  0x61   : > { %320 = vadd.xlane.f32.xlu0 %v319_v53  ;;  %2395 = vst [vmem:[#allocation22_spill] sm:$0xff] %v1854_v52  ;;  %v1857_v53 = vld [vmem:[%s1633_s15 + $0x1a8] sm:$0xff] }
  0x62   : > { %2396 = vst [vmem:[#allocation23_spill] sm:$0xff] %v1857_v53 }
  0x64   : > { %329 = vadd.xlane.f32.xlu1 %v328_v58  ;;  %v352_v58 = vadd.f32 %v1851_v47, %v1848_v46  ;;  %v1880_v46 = vld [vmem:[%s1633_s15 + $0x1f0] sm:$0xff]  ;;  %v1889_v47 = vld [vmem:[%s1633_s15 + $0x1e8] sm:$0xff] }
  0x65   : > { %326 = vadd.xlane.f32.xlu0 %v325_v59  ;;  %v349_v59 = vadd.f32 %v1857_v53, %v1854_v52  ;;  %2401 = vst [vmem:[#allocation28_spill] sm:$0xff] %v1880_v46  ;;  %v1883_v52 = vld [vmem:[%s1633_s15 + $0x1f8] sm:$0xff]  ;;  %v1886_v53 = vld [vmem:[%s1633_s15 + $0x1e0] sm:$0xff]  ;;  %2404 = vst [vmem:[#allocation31_spill] sm:$0xff] %v1889_v47 }
  0x66   : > { %2402 = vst [vmem:[#allocation29_spill] sm:$0xff] %v1883_v52  ;;  %2403 = vst [vmem:[#allocation30_spill] sm:$0xff] %v1886_v53 }
  0x68   : > { %335 = vadd.xlane.f32.xlu1 %v334_v3  ;;  %v1864_v3 = vld [vmem:[%s1633_s15 + $0x1d0] sm:$0xff] }
  0x69   : > { %332 = vadd.xlane.f32.xlu0 %v331_v7  ;;  %2397 = vst [vmem:[#allocation24_spill] sm:$0xff] %v1864_v3  ;;  %v1867_v7 = vld [vmem:[%s1633_s15 + $0x1d8] sm:$0xff] }
  0x6a   : > { %2398 = vst [vmem:[#allocation25_spill] sm:$0xff] %v1867_v7 }
  0x6c   : > { %341 = vadd.xlane.f32.xlu1 %v340_v22  ;;  %v1870_v22 = vld [vmem:[%s1633_s15 + $0x1c0] sm:$0xff] }
  0x6d   : > { %338 = vadd.xlane.f32.xlu0 %v337_v23  ;;  %2399 = vst [vmem:[#allocation26_spill] sm:$0xff] %v1870_v22  ;;  %v1873_v23 = vld [vmem:[%s1633_s15 + $0x1c8] sm:$0xff] }
  0x6e   : > { %2400 = vst [vmem:[#allocation27_spill] sm:$0xff] %v1873_v23 }
  0x70   : > { %347 = vadd.xlane.f32.xlu1 %v346_v40  ;;  %v358_v40 = vadd.f32 %v1867_v7, %v1864_v3 }
  0x71   : > { %344 = vadd.xlane.f32.xlu0 %v343_v41  ;;  %v355_v41 = vadd.f32 %v1873_v23, %v1870_v22  ;;  %v465_v22 = vlaneseq }
  0x73   : > { %v1896_v35 = vshrl.u32 %v465_v22, 7 }
  0x74   : > { %353 = vadd.xlane.f32.xlu1 %v352_v58  ;;  %v364_v58 = vadd.f32 %v1883_v52, %v1880_v46 }
  0x75   : > { %350 = vadd.xlane.f32.xlu0 %v349_v59  ;;  %v361_v59 = vadd.f32 %v1889_v47, %v1886_v53  ;;  %v468_v52 = vadd.s32 16, %v1896_v35  ;;  %v1900_v53 = vand.u32 127, %v465_v22  ;;  %v1932_v29 = vadd.s32 48, %v1896_v35 }
  0x77   : > { %vm538_vm1 = vcmp.eq.s32.totalorder %v468_v52, %v1900_v53  ;;  %vm534_vm2 = vcmp.eq.s32.totalorder %v1896_v35, %v1900_v53  ;;  %vm546_vm8 = vcmp.eq.s32.totalorder %v1932_v29, %v1900_v53 }
  0x78   : > { %359 = vadd.xlane.f32.xlu1 %v358_v40 }
  0x79   : > { %356 = vadd.xlane.f32.xlu0 %v355_v41 }
  0x7c   : > { %365 = vadd.xlane.f32.xlu1 %v364_v58  ;;  %v469_v58 = vadd.s32 24, %v1896_v35 }
  0x7d   : > { %362 = vadd.xlane.f32.xlu0 %v361_v59 }
  0x7e   : > { %vm540_vm3 = vcmp.eq.s32.totalorder %v469_v58, %v1900_v53 }
  0xcd   : > { %v279_v3 = vpop.xlane.xlu1 %278 }
  0xce   : > { %v369_v23 = vadd.f32 1.0, %v279_v3  ;;  %v273_v7 = vpop.xlane.xlu0 %272 }
  0xcf   : > { %v367_v34 = vadd.f32 1.0, %v273_v7  ;;  %v467_v7 = vadd.s32 8, %v1896_v35 }
  0xd0   : > { %1318 = vrsqrt.f32 %v369_v23  ;;  %v1905_v23 = vadd.s32 40, %v1896_v35 }
  0xd1   : > { %1320 = vrsqrt.f32 %v367_v34  ;;  %v282_v40 = vpop.xlane.xlu1 %281  ;;  %vm536_vm4 = vcmp.eq.s32.totalorder %v467_v7, %v1900_v53 }
  0xd2   : > { %v370_v28 = vadd.f32 1.0, %v282_v40  ;;  %v276_v46 = vpop.xlane.xlu0 %275  ;;  %vm544_vm5 = vcmp.eq.s32.totalorder %v1905_v23, %v1900_v53 }
  0xd3   : > { %v368_v41 = vadd.f32 1.0, %v276_v46 }
  0xd4   : > { %1322 = vrsqrt.f32 %v370_v28  ;;  %v1914_v28 = vadd.s32 32, %v1896_v35 }
  0xd5   : > { %1324 = vrsqrt.f32 %v368_v41  ;;  %v288_v3 = vpop.xlane.xlu1 %287  ;;  %v1923_v41 = vadd.s32 56, %v1896_v35 }
  0xd6   : > { %v372_v34 = vadd.f32 1.0, %v288_v3  ;;  %v285_v59 = vpop.xlane.xlu0 %284  ;;  %vm542_vm6 = vcmp.eq.s32.totalorder %v1914_v28, %v1900_v53 }
  0xd7   : > { %v371_v40 = vadd.f32 1.0, %v285_v59  ;;  %vm548_vm7 = vcmp.eq.s32.totalorder %v1923_v41, %v1900_v53 }
  0xd8   : > { %1326 = vrsqrt.f32 %v372_v34 }
  0xd9   : > { %1328 = vrsqrt.f32 %v371_v40  ;;  %v294_v46 = vpop.xlane.xlu1 %293 }
  0xda   : > { %v1319_v22 = vpop.eup %1318  ;;  %v374_v3 = vadd.f32 1.0, %v294_v46  ;;  %v291_v34 = vpop.xlane.xlu0 %290 }
  0xdb   : > { %v1321_v59 = vpop.eup %1320  ;;  %434 = vst.msk [vmem:[%s1910_s6 + $0x10] sm:$0xff] %vm431_vm0, %v1319_v22  ;;  %v602_v47 = vsel %vm538_vm1, %v1319_v22, 0.0  ;;  %v666_v40 = vmul.f32 %v1319_v22, %v1640_v0  ;;  %v373_v16 = vadd.f32 1.0, %v291_v34  ;;  %v667_v52 = vmul.f32 %v1319_v22, %v1643_v1 }
  0xdc   : > { %432 = vst.msk [vmem:[%s1910_s6] sm:$0xff] %vm431_vm0, %v1321_v59  ;;  %v598_v46 = vsel %vm534_vm2, %v1321_v59, 0.0  ;;  %v662_v17 = vmul.f32 %v1321_v59, %v1646_v2  ;;  %1330 = vrsqrt.f32 %v374_v3  ;;  %v1944_v34 = vadd.s32 72, %v1896_v35 }
  0xdd   : > { %v730_v0 = vadd.f32 %v666_v40, %v602_v47  ;;  %1332 = vrsqrt.f32 %v373_v16  ;;  %v300_v10 = vpop.xlane.xlu1 %299  ;;  %v663_v62 = vmul.f32 %v1321_v59, %v1651_v4  ;;  %v1962_v47 = vadd.s32 64, %v1896_v35 }
  0xde   : > { %v1323_v11 = vpop.eup %1322  ;;  %v726_v63 = vadd.f32 %v662_v17, %v598_v46  ;;  %v376_v2 = vadd.f32 1.0, %v300_v10  ;;  %v297_v60 = vpop.xlane.xlu0 %296  ;;  %vm552_vm9 = vcmp.eq.s32.totalorder %v1944_v34, %v1900_v53  ;;  %v1975_v59 = vadd.s32 88, %v1896_v35 }
  0xdf   : > { %v1325_v3 = vpop.eup %1324  ;;  %v1221_v56 = vpack.c.bf16 %v667_v52, %v730_v0  ;;  %435 = vst.msk [vmem:[%s1910_s6 + $0x18] sm:$0xff] %vm431_vm0, %v1323_v11  ;;  %v604_v1 = vsel %vm540_vm3, %v1323_v11, 0.0  ;;  %v668_v16 = vmul.f32 %v1323_v11, %v1654_v5  ;;  %v669_v5 = vmul.f32 %v1323_v11, %v1657_v6 }
  0xe0   : > { %v1219_v4 = vpack.c.bf16 %v663_v62, %v726_v63  ;;  %433 = vst.msk [vmem:[%s1910_s6 + $0x8] sm:$0xff] %vm431_vm0, %v1325_v3  ;;  %v600_v17 = vsel %vm536_vm4, %v1325_v3, 0.0  ;;  %v664_v10 = vmul.f32 %v1325_v3, %v1662_v8  ;;  %1334 = vrsqrt.f32 %v376_v2 }
  0xe1   : > { %984 = vst [vmem:[%s1966_s18 + $0x10] sm:$0xff] %v1221_v56  ;;  %v732_v62 = vadd.f32 %v668_v16, %v604_v1  ;;  %v375_v63 = vadd.f32 1.0, %v297_v60  ;;  %v306_v8 = vpop.xlane.xlu1 %305  ;;  %v665_v7 = vmul.f32 %v1325_v3, %v1665_v9  ;;  %v1984_v9 = vadd.s32 80, %v1896_v35 }
  0xe2   : > { %v1327_v58 = vpop.eup %1326  ;;  %982 = vst [vmem:[%s1966_s18] sm:$0xff] %v1219_v4  ;;  %v728_v22 = vadd.f32 %v664_v10, %v600_v17  ;;  %v378_v56 = vadd.f32 1.0, %v306_v8  ;;  %v303_v40 = vpop.xlane.xlu0 %302  ;;  %v1993_v3 = vadd.s32 104, %v1896_v35  ;;  %vm550_vm10 = vcmp.eq.s32.totalorder %v1962_v47, %v1900_v53 }
  0xe3   : > { %v1329_v6 = vpop.eup %1328  ;;  %v1222_v11 = vpack.c.bf16 %v669_v5, %v732_v62  ;;  %437 = vst.msk [vmem:[%s1910_s6 + $0x28] sm:$0xff] %vm431_vm0, %v1327_v58  ;;  %v608_v60 = vsel %vm544_vm5, %v1327_v58, 0.0  ;;  %v672_v46 = vmul.f32 %v1327_v58, %v1672_v12  ;;  %v673_v23 = vmul.f32 %v1327_v58, %v1675_v13 }
  0xe4   : > { %v1220_v52 = vpack.c.bf16 %v665_v7, %v728_v22  ;;  %436 = vst.msk [vmem:[%s1910_s6 + $0x20] sm:$0xff] %vm431_vm0, %v1329_v6  ;;  %v606_v0 = vsel %vm542_vm6, %v1329_v6, 0.0  ;;  %v670_v2 = vmul.f32 %v1329_v6, %v1678_v14  ;;  %1336 = vrsqrt.f32 %v375_v63 }
  0xe5   : > { %985 = vst [vmem:[%s1966_s18 + $0x18] sm:$0xff] %v1222_v11  ;;  %v736_v12 = vadd.f32 %v672_v46, %v608_v60  ;;  %v377_v1 = vadd.f32 1.0, %v303_v40  ;;  %v312_v16 = vpop.xlane.xlu1 %311  ;;  %v671_v28 = vmul.f32 %v1329_v6, %v1681_v15  ;;  %vm556_vm11 = vcmp.eq.s32.totalorder %v1975_v59, %v1900_v53 }
  0xe6   : > { %v1331_v4 = vpop.eup %1330  ;;  %983 = vst [vmem:[%s1966_s18 + $0x8] sm:$0xff] %v1220_v52  ;;  %v734_v14 = vadd.f32 %v670_v2, %v606_v0  ;;  %1338 = vrsqrt.f32 %v378_v56  ;;  %v380_v13 = vadd.f32 1.0, %v312_v16  ;;  %v309_v17 = vpop.xlane.xlu0 %308  ;;  %v2010_v15 = vadd.s32 96, %v1896_v35 }
  0xe7   : > { %v1333_v10 = vpop.eup %1332  ;;  %v1224_v5 = vpack.c.bf16 %v673_v23, %v736_v12  ;;  %439 = vst.msk [vmem:[%s1910_s6 + $0x38] sm:$0xff] %vm431_vm0, %v1331_v4  ;;  %v612_v62 = vsel %vm548_vm7, %v1331_v4, 0.0  ;;  %v676_v63 = vmul.f32 %v1331_v4, %v1688_v18  ;;  %v2019_v22 = vadd.s32 120, %v1896_v35 }
  0xe8   : > { %v1223_v8 = vpack.c.bf16 %v671_v28, %v734_v14  ;;  %438 = vst.msk [vmem:[%s1910_s6 + $0x30] sm:$0xff] %vm431_vm0, %v1333_v10  ;;  %v610_v58 = vsel %vm546_vm8, %v1333_v10, 0.0  ;;  %v674_v7 = vmul.f32 %v1333_v10, %v1694_v20  ;;  %v677_v41 = vmul.f32 %v1331_v4, %v1691_v19 }
  0xe9   : > { %987 = vst [vmem:[%s1966_s18 + $0x28] sm:$0xff] %v1224_v5  ;;  %v740_v56 = vadd.f32 %v676_v63, %v612_v62  ;;  %vm554_vm12 = vcmp.eq.s32.totalorder %v1984_v9, %v1900_v53  ;;  %1340 = vrsqrt.f32 %v377_v1  ;;  %v379_v18 = vadd.f32 1.0, %v309_v17  ;;  %v318_v40 = vpop.xlane.xlu1 %317 }
  0xea   : > { %986 = vst [vmem:[%s1966_s18 + $0x20] sm:$0xff] %v1223_v8  ;;  %v675_v29 = vmul.f32 %v1333_v10, %v1697_v21  ;;  %v738_v6 = vadd.f32 %v674_v7, %v610_v58  ;;  %1342 = vrsqrt.f32 %v380_v13  ;;  %v382_v20 = vadd.f32 1.0, %v318_v40  ;;  %v315_v11 = vpop.xlane.xlu0 %314  ;;  %v1335_v60 = vpop.eup %1334 }
  0xeb   : > { %v1226_v46 = vpack.c.bf16 %v677_v41, %v740_v56  ;;  %1344 = vrsqrt.f32 %v379_v18  ;;  %v2028_v19 = vadd.s32 112, %v1896_v35  ;;  %v381_v52 = vadd.f32 1.0, %v315_v11  ;;  %441 = vst.msk [vmem:[%s1910_s6 + $0x48] sm:$0xff] %vm431_vm0, %v1335_v60 }
  0xec   : > { %v1225_v0 = vpack.c.bf16 %v675_v29, %v738_v6  ;;  %v616_v2 = vsel %vm552_vm9, %v1335_v60, 0.0  ;;  %v680_v21 = vmul.f32 %v1335_v60, %v1704_v24  ;;  %vm560_vm13 = vcmp.eq.s32.totalorder %v1993_v3, %v1900_v53 }
  0xed   : > { %989 = vst [vmem:[%s1966_s18 + $0x38] sm:$0xff] %v1226_v46  ;;  %1346 = vrsqrt.f32 %v382_v20  ;;  %v2040_v23 = vadd.s32 136, %v1896_v35  ;;  %v2043_v12 = vadd.s32 128, %v1900_v53  ;;  %v324_v1 = vpop.xlane.xlu1 %323  ;;  %v2046_v16 = vadd.s32 128, %v1896_v35 }
  0xee   : > { %988 = vst [vmem:[%s1966_s18 + $0x30] sm:$0xff] %v1225_v0  ;;  %v681_v34 = vmul.f32 %v1335_v60, %v1707_v25  ;;  %v744_v24 = vadd.f32 %v680_v21, %v616_v2  ;;  %1348 = vrsqrt.f32 %v381_v52  ;;  %v384_v4 = vadd.f32 1.0, %v324_v1  ;;  %v321_v28 = vpop.xlane.xlu0 %320  ;;  %v1337_v14 = vpop.eup %1336 }
  0xef   : > { %vm558_vm14 = vcmp.eq.s32.totalorder %v2010_v15, %v1900_v53  ;;  %vm564_vm15 = vcmp.eq.s32.totalorder %v2019_v22, %v1900_v53  ;;  %vm562_vm1 = vcmp.eq.s32.totalorder %v2028_v19, %v1900_v53  ;;  %v383_v13 = vadd.f32 1.0, %v321_v28  ;;  %440 = vst.msk [vmem:[%s1910_s6 + $0x40] sm:$0xff] %vm431_vm0, %v1337_v14 }
  0xf0   : > { %v1339_v17 = vpop.eup %1338  ;;  %v1228_v10 = vpack.c.bf16 %v681_v34, %v744_v24  ;;  %v614_v25 = vsel %vm550_vm10, %v1337_v14, 0.0  ;;  %v678_v5 = vmul.f32 %v1337_v14, %v1710_v26  ;;  %v2063_v62 = vadd.s32 152, %v1896_v35 }
  0xf1   : > { %443 = vst.msk [vmem:[%s1910_s6 + $0x58] sm:$0xff] %vm431_vm0, %v1339_v17  ;;  %v620_v63 = vsel %vm556_vm11, %v1339_v17, 0.0  ;;  %v684_v8 = vmul.f32 %v1339_v17, %v1720_v30  ;;  %vm569_vm2 = vcmp.eq.s32.totalorder %v2040_v23, %v2043_v12  ;;  %1350 = vrsqrt.f32 %v384_v4  ;;  %v330_v58 = vpop.xlane.xlu1 %329 }
  0xf2   : > { %v2074_v47 = vadd.s32 144, %v1896_v35  ;;  %991 = vst [vmem:[%s1966_s18 + $0x48] sm:$0xff] %v1228_v10  ;;  %v679_v26 = vmul.f32 %v1337_v14, %v1713_v27  ;;  %v742_v7 = vadd.f32 %v678_v5, %v614_v25  ;;  %vm567_vm3 = vcmp.eq.s32.totalorder %v2046_v16, %v2043_v12  ;;  %v327_v59 = vpop.xlane.xlu0 %326 }
  0xf3   : > { %1352 = vrsqrt.f32 %v383_v13  ;;  %v2081_v30 = vadd.s32 168, %v1896_v35  ;;  %v1341_v41 = vpop.eup %1340  ;;  %v685_v56 = vmul.f32 %v1339_v17, %v1723_v31  ;;  %v748_v18 = vadd.f32 %v684_v8, %v620_v63 }
  0xf4   : > { %v386_v40 = vadd.f32 1.0, %v330_v58  ;;  %v2085_v29 = vadd.s32 160, %v1896_v35  ;;  %v1343_v27 = vpop.eup %1342  ;;  %v1227_v6 = vpack.c.bf16 %v679_v26, %v742_v7  ;;  %442 = vst.msk [vmem:[%s1910_s6 + $0x50] sm:$0xff] %vm431_vm0, %v1341_v41  ;;  %v618_v20 = vsel %vm554_vm12, %v1341_v41, 0.0 }
  0xf5   : > { %v682_v11 = vmul.f32 %v1341_v41, %v1726_v32  ;;  %v385_v60 = vadd.f32 1.0, %v327_v59  ;;  %v1345_v31 = vpop.eup %1344  ;;  %v1230_v46 = vpack.c.bf16 %v685_v56, %v748_v18  ;;  %v683_v52 = vmul.f32 %v1341_v41, %v1729_v33  ;;  %445 = vst.msk [vmem:[%s1910_s6 + $0x68] sm:$0xff] %vm431_vm0, %v1343_v27  ;;  %v336_v21 = vpop.xlane.xlu1 %335 }
  0xf6   : > { %v624_v0 = vsel %vm560_vm13, %v1343_v27, 0.0  ;;  %v688_v2 = vmul.f32 %v1343_v27, %v1736_v36  ;;  %990 = vst [vmem:[%s1966_s18 + $0x40] sm:$0xff] %v1227_v6  ;;  %v689_v32 = vmul.f32 %v1343_v27, %v1739_v37  ;;  %444 = vst.msk [vmem:[%s1910_s6 + $0x60] sm:$0xff] %vm431_vm0, %v1345_v31  ;;  %v622_v33 = vsel %vm558_vm14, %v1345_v31, 0.0  ;;  %v333_v34 = vpop.xlane.xlu0 %332 }
  0xf7   : > { %v746_v9 = vadd.f32 %v682_v11, %v618_v20  ;;  %v686_v1 = vmul.f32 %v1345_v31, %v1742_v38  ;;  %v1347_v3 = vpop.eup %1346  ;;  %993 = vst [vmem:[%s1966_s18 + $0x58] sm:$0xff] %v1230_v46  ;;  %v687_v36 = vmul.f32 %v1345_v31, %v1745_v39  ;;  %vm573_vm4 = vcmp.eq.s32.totalorder %v2063_v62, %v2043_v12 }
  0xf8   : > { %v752_v24 = vadd.f32 %v688_v2, %v624_v0  ;;  %1354 = vrsqrt.f32 %v386_v40  ;;  %v388_v37 = vadd.f32 1.0, %v336_v21  ;;  %v1349_v4 = vpop.eup %1348  ;;  %447 = vst.msk [vmem:[%s1910_s6 + $0x78] sm:$0xff] %vm431_vm0, %v1347_v3  ;;  %v628_v38 = vsel %vm564_vm15, %v1347_v3, 0.0 }
  0xf9   : > { %v1229_v28 = vpack.c.bf16 %v683_v52, %v746_v9  ;;  %v750_v14 = vadd.f32 %v686_v1, %v622_v33  ;;  %v692_v15 = vmul.f32 %v1347_v3, %v1752_v42  ;;  %446 = vst.msk [vmem:[%s1910_s6 + $0x70] sm:$0xff] %vm431_vm0, %v1349_v4  ;;  %v626_v39 = vsel %vm562_vm1, %v1349_v4, 0.0  ;;  %v342_v25 = vpop.xlane.xlu1 %341 }
  0xfa   : > { %v1232_v13 = vpack.c.bf16 %v689_v32, %v752_v24  ;;  %v690_v17 = vmul.f32 %v1349_v4, %v1758_v44  ;;  %v387_v10 = vadd.f32 1.0, %v333_v34  ;;  %v693_v22 = vmul.f32 %v1347_v3, %v1755_v43  ;;  %v339_v42 = vpop.xlane.xlu0 %338 }
  0xfb   : > { %992 = vst [vmem:[%s1966_s18 + $0x50] sm:$0xff] %v1229_v28  ;;  %v1231_v5 = vpack.c.bf16 %v687_v36, %v750_v14  ;;  %v756_v63 = vadd.f32 %v692_v15, %v628_v38  ;;  %vm571_vm5 = vcmp.eq.s32.totalorder %v2074_v47, %v2043_v12  ;;  %1356 = vrsqrt.f32 %v385_v60  ;;  %v1351_v8 = vpop.eup %1350 }
  0xfc   : > { %995 = vst [vmem:[%s1966_s18 + $0x68] sm:$0xff] %v1232_v13  ;;  %v691_v53 = vmul.f32 %v1349_v4, %v1761_v45  ;;  %v754_v44 = vadd.f32 %v690_v17, %v626_v39  ;;  %1358 = vrsqrt.f32 %v388_v37  ;;  %v390_v19 = vadd.f32 1.0, %v342_v25  ;;  %449 = vst.msk [vmem:[%s1910_s6 + $0x88] sm:$0xff] %vm431_vm0, %v1351_v8  ;;  %v2406_v13 = vld [vmem:[#allocation9_spill] sm:$0xff] }
  0xfd   : > { %v1353_v58 = vpop.eup %1352  ;;  %994 = vst [vmem:[%s1966_s18 + $0x60] sm:$0xff] %v1231_v5  ;;  %v1234_v26 = vpack.c.bf16 %v693_v22, %v756_v63  ;;  %v633_v43 = vsel %vm569_vm2, %v1351_v8, 0.0  ;;  %v697_v7 = vmul.f32 %v1351_v8, %v1771_v49  ;;  %v389_v59 = vadd.f32 1.0, %v339_v42  ;;  %v348_v40 = vpop.xlane.xlu1 %347  ;;  %v2407_v5 = vld [vmem:[#allocation11_spill] sm:$0xff] }
  0xfe   : > { %v1233_v41 = vpack.c.bf16 %v691_v53, %v754_v44  ;;  %448 = vst.msk [vmem:[%s1910_s6 + $0x80] sm:$0xff] %vm431_vm0, %v1353_v58  ;;  %v631_v45 = vsel %vm567_vm3, %v1353_v58, 0.0  ;;  %v695_v56 = vmul.f32 %v1353_v58, %v1777_v51  ;;  %v2144_v18 = vadd.s32 184, %v1896_v35  ;;  %v345_v6 = vpop.xlane.xlu0 %344  ;;  %v2408_v53 = vld [vmem:[#allocation10_spill] sm:$0xff] }
  0xff   : > { %997 = vst [vmem:[%s1966_s18 + $0x78] sm:$0xff] %v1234_v26  ;;  %v696_v23 = vmul.f32 %v1351_v8, %v1768_v48  ;;  %v761_v27 = vadd.f32 %v697_v7, %v633_v43  ;;  %1360 = vrsqrt.f32 %v387_v10  ;;  %v392_v49 = vadd.f32 1.0, %v348_v40  ;;  %v2410_v7 = vld [vmem:[#allocation12_spill] sm:$0xff] }
 0x100   : > { %996 = vst [vmem:[%s1966_s18 + $0x70] sm:$0xff] %v1233_v41  ;;  %v694_v20 = vmul.f32 %v1353_v58, %v1774_v50  ;;  %v759_v16 = vadd.f32 %v695_v56, %v631_v45  ;;  %1362 = vrsqrt.f32 %v390_v19  ;;  %v391_v11 = vadd.f32 1.0, %v345_v6  ;;  %v2409_v58 = vld [vmem:[#allocation13_spill] sm:$0xff]  ;;  %v2411_v45 = vld [vmem:[#allocation15_spill] sm:$0xff] }
 0x101   : > { %v1236_v51 = vpack.c.bf16 %v761_v27, %v696_v23  ;;  %vm577_vm6 = vcmp.eq.s32.totalorder %v2081_v30, %v2043_v12  ;;  %v2153_v60 = vadd.s32 176, %v1896_v35  ;;  %1364 = vrsqrt.f32 %v389_v59  ;;  %v354_v50 = vpop.xlane.xlu1 %353  ;;  %v2412_v23 = vld [vmem:[#allocation14_spill] sm:$0xff]  ;;  %v2413_v6 = vld [vmem:[#allocation17_spill] sm:$0xff] }
 0x102   : > { %v1355_v48 = vpop.eup %1354  ;;  %v1235_v31 = vpack.c.bf16 %v759_v16, %v694_v20  ;;  %vm575_vm7 = vcmp.eq.s32.totalorder %v2085_v29, %v2043_v12  ;;  %v2158_v46 = vadd.s32 200, %v1896_v35  ;;  %1366 = vrsqrt.f32 %v392_v49  ;;  %v351_v21 = vpop.xlane.xlu0 %350 }
 0x103   : > { %999 = vst [vmem:[%s1966_s18 + $0x88] sm:$0xff] %v1236_v51  ;;  %451 = vst.msk [vmem:[%s1910_s6 + $0x98] sm:$0xff] %vm431_vm0, %v1355_v48  ;;  %v637_v52 = vsel %vm573_vm4, %v1355_v48, 0.0  ;;  %v701_v0 = vmul.f32 %v1355_v48, %v1787_v55  ;;  %v2168_v2 = vadd.s32 192, %v1896_v35  ;;  %1368 = vrsqrt.f32 %v391_v11 }
 0x104   : > { %998 = vst [vmem:[%s1966_s18 + $0x80] sm:$0xff] %v1235_v31  ;;  %vm581_vm8 = vcmp.eq.s32.totalorder %v2144_v18, %v2043_v12  ;;  %v2174_v9 = vadd.s32 216, %v1896_v35  ;;  %v394_v32 = vadd.f32 1.0, %v354_v50  ;;  %v393_v33 = vadd.f32 1.0, %v351_v21 }
 0x105   : > { %v1357_v62 = vpop.eup %1356  ;;  %v700_v1 = vmul.f32 %v1355_v48, %v1784_v54  ;;  %v765_v34 = vadd.f32 %v701_v0, %v637_v52  ;;  %vm579_vm9 = vcmp.eq.s32.totalorder %v2153_v60, %v2043_v12  ;;  %v2180_v55 = vadd.s32 208, %v1896_v35  ;;  %v360_v54 = vpop.xlane.xlu1 %359  ;;  %v2414_v48 = vld [vmem:[#allocation16_spill] sm:$0xff] }
 0x106   : > { %v1359_v3 = vpop.eup %1358  ;;  %450 = vst.msk [vmem:[%s1910_s6 + $0x90] sm:$0xff] %vm431_vm0, %v1357_v62  ;;  %v635_v24 = vsel %vm571_vm5, %v1357_v62, 0.0  ;;  %v699_v36 = vmul.f32 %v1357_v62, %v1793_v57  ;;  %vm585_vm10 = vcmp.eq.s32.totalorder %v2158_v46, %v2043_v12  ;;  %1370 = vrsqrt.f32 %v394_v32  ;;  %v357_v47 = vpop.xlane.xlu0 %356  ;;  %v2405_v57 = vld [vmem:[#allocation8_spill] sm:$0xff]  ;;  %v2415_v46 = vld [vmem:[#allocation19_spill] sm:$0xff] }
 0x107   : > { %v1238_v37 = vpack.c.bf16 %v765_v34, %v700_v1  ;;  %453 = vst.msk [vmem:[%s1910_s6 + $0xa8] sm:$0xff] %vm431_vm0, %v1359_v3  ;;  %v641_v4 = vsel %vm577_vm6, %v1359_v3, 0.0  ;;  %v705_v28 = vmul.f32 %v1359_v3, %v1803_v61  ;;  %vm583_vm11 = vcmp.eq.s32.totalorder %v2168_v2, %v2043_v12 }
 0x108   : > { %v698_v14 = vmul.f32 %v1357_v62, %v2405_v57  ;;  %v763_v38 = vadd.f32 %v699_v36, %v635_v24  ;;  %vm589_vm12 = vcmp.eq.s32.totalorder %v2174_v9, %v2043_v12  ;;  %1372 = vrsqrt.f32 %v393_v33  ;;  %v2418_v57 = vld [vmem:[#allocation23_spill] sm:$0xff] }
 0x109   : > { %v1361_v15 = vpop.eup %1360  ;;  %1001 = vst [vmem:[%s1966_s18 + $0x98] sm:$0xff] %v1238_v37  ;;  %v704_v30 = vmul.f32 %v1359_v3, %v2406_v13  ;;  %v769_v39 = vadd.f32 %v705_v28, %v641_v4  ;;  %vm587_vm13 = vcmp.eq.s32.totalorder %v2180_v55, %v2043_v12  ;;  %v396_v61 = vadd.f32 1.0, %v360_v54  ;;  %v366_v16 = vpop.xlane.xlu1 %365  ;;  %v2416_v3 = vld [vmem:[#allocation18_spill] sm:$0xff]  ;;  %v2417_v37 = vld [vmem:[#allocation21_spill] sm:$0xff] }
 0x10a   : > { %v1363_v17 = vpop.eup %1362  ;;  %v1237_v10 = vpack.c.bf16 %v763_v38, %v698_v14  ;;  %452 = vst.msk [vmem:[%s1910_s6 + $0xa0] sm:$0xff] %vm431_vm0, %v1361_v15  ;;  %v639_v25 = vsel %vm575_vm7, %v1361_v15, 0.0  ;;  %v703_v22 = vmul.f32 %v1361_v15, %v2407_v5  ;;  %v395_v63 = vadd.f32 1.0, %v357_v47  ;;  %v363_v11 = vpop.xlane.xlu0 %362  ;;  %v2419_v38 = vld [vmem:[#allocation20_spill] sm:$0xff] }
 0x10b   : > { %v1365_v42 = vpop.eup %1364  ;;  %v1240_v8 = vpack.c.bf16 %v769_v39, %v704_v30  ;;  %v702_v44 = vmul.f32 %v1361_v15, %v2408_v53  ;;  %455 = vst.msk [vmem:[%s1910_s6 + $0xb8] sm:$0xff] %vm431_vm0, %v1363_v17  ;;  %v645_v19 = vsel %vm581_vm8, %v1363_v17, 0.0  ;;  %v709_v26 = vmul.f32 %v1363_v17, %v2409_v58  ;;  %v2420_v39 = vld [vmem:[#allocation22_spill] sm:$0xff] }
 0x10c   : > { %v1367_v43 = vpop.eup %1366  ;;  %1000 = vst [vmem:[%s1966_s18 + $0x90] sm:$0xff] %v1237_v10  ;;  %v767_v29 = vadd.f32 %v703_v22, %v639_v25  ;;  %v708_v59 = vmul.f32 %v1363_v17, %v2410_v7  ;;  %454 = vst.msk [vmem:[%s1910_s6 + $0xb0] sm:$0xff] %vm431_vm0, %v1365_v42  ;;  %v643_v41 = vsel %vm579_vm9, %v1365_v42, 0.0  ;;  %v707_v56 = vmul.f32 %v1365_v42, %v2411_v45  ;;  %v2424_v7 = vld [vmem:[#allocation26_spill] sm:$0xff] }
 0x10d   : > { %v1369_v40 = vpop.eup %1368  ;;  %1003 = vst [vmem:[%s1966_s18 + $0xa8] sm:$0xff] %v1240_v8  ;;  %v773_v18 = vadd.f32 %v709_v26, %v645_v19  ;;  %v706_v27 = vmul.f32 %v1365_v42, %v2412_v23  ;;  %457 = vst.msk [vmem:[%s1910_s6 + $0xc8] sm:$0xff] %vm431_vm0, %v1367_v43  ;;  %v649_v49 = vsel %vm585_vm10, %v1367_v43, 0.0  ;;  %v713_v20 = vmul.f32 %v1367_v43, %v2413_v6  ;;  %v2421_v8 = vld [vmem:[#allocation25_spill] sm:$0xff]  ;;  %v2422_v19 = vld [vmem:[#allocation27_spill] sm:$0xff] }
 0x10e   : > { %v1239_v51 = vpack.c.bf16 %v767_v29, %v702_v44  ;;  %v771_v60 = vadd.f32 %v707_v56, %v643_v41  ;;  %v712_v31 = vmul.f32 %v1367_v43, %v2414_v48  ;;  %456 = vst.msk [vmem:[%s1910_s6 + $0xc0] sm:$0xff] %vm431_vm0, %v1369_v40  ;;  %v647_v50 = vsel %vm583_vm11, %v1369_v40, 0.0  ;;  %v2423_v43 = vld [vmem:[#allocation24_spill] sm:$0xff]  ;;  %v2425_v56 = vld [vmem:[#allocation29_spill] sm:$0xff] }
 0x10f   : > { %v1242_v52 = vpack.c.bf16 %v773_v18, %v708_v59  ;;  %v777_v0 = vadd.f32 %v713_v20, %v649_v49  ;;  %v711_v21 = vmul.f32 %v1369_v40, %v2415_v46  ;;  %1374 = vrsqrt.f32 %v396_v61  ;;  %v2426_v49 = vld [vmem:[#allocation28_spill] sm:$0xff] }
 0x110   : > { %v1371_v32 = vpop.eup %1370  ;;  %1002 = vst [vmem:[%s1966_s18 + $0xa0] sm:$0xff] %v1239_v51  ;;  %v1241_v33 = vpack.c.bf16 %v771_v60, %v706_v27  ;;  %1376 = vrsqrt.f32 %v395_v63  ;;  %v398_v62 = vadd.f32 1.0, %v366_v16  ;;  %v397_v1 = vadd.f32 1.0, %v363_v11  ;;  %v2427_v16 = vld [vmem:[#allocation31_spill] sm:$0xff]  ;;  %v2428_v60 = vld [vmem:[#allocation30_spill] sm:$0xff] }
 0x111   : > { %1005 = vst [vmem:[%s1966_s18 + $0xb8] sm:$0xff] %v1242_v52  ;;  %v1244_v34 = vpack.c.bf16 %v777_v0, %v712_v31  ;;  %v710_v2 = vmul.f32 %v1369_v40, %v2416_v3  ;;  %v775_v24 = vadd.f32 %v711_v21, %v647_v50  ;;  %459 = vst.msk [vmem:[%s1910_s6 + $0xd8] sm:$0xff] %vm431_vm0, %v1371_v32  ;;  %v653_v36 = vsel %vm589_vm12, %v1371_v32, 0.0 }
 0x112   : > { %v1373_v54 = vpop.eup %1372  ;;  %1004 = vst [vmem:[%s1966_s18 + $0xb0] sm:$0xff] %v1241_v33  ;;  %v717_v4 = vmul.f32 %v1371_v32, %v2417_v37  ;;  %1378 = vrsqrt.f32 %v398_v62  ;;  %v495_v9 = vadd.s32 232, %v1896_v35  ;;  %v716_v15 = vmul.f32 %v1371_v32, %v2419_v38 }
 0x113   : > { %1007 = vst [vmem:[%s1966_s18 + $0xc8] sm:$0xff] %v1244_v34  ;;  %v1243_v28 = vpack.c.bf16 %v775_v24, %v710_v2  ;;  %458 = vst.msk [vmem:[%s1910_s6 + $0xd0] sm:$0xff] %vm431_vm0, %v1373_v54  ;;  %v651_v47 = vsel %vm587_vm13, %v1373_v54, 0.0  ;;  %v715_v14 = vmul.f32 %v1373_v54, %v2418_v57  ;;  %v494_v30 = vadd.s32 224, %v1896_v35 }
 0x114   : > { %v781_v13 = vadd.f32 %v717_v4, %v653_v36  ;;  %1380 = vrsqrt.f32 %v397_v1  ;;  %v714_v61 = vmul.f32 %v1373_v54, %v2420_v39  ;;  %v497_v55 = vadd.s32 248, %v1896_v35 }
 0x115   : > { %1006 = vst [vmem:[%s1966_s18 + $0xc0] sm:$0xff] %v1243_v28  ;;  %v779_v17 = vadd.f32 %v715_v14, %v651_v47  ;;  %vm593_vm14 = vcmp.eq.s32.totalorder %v495_v9, %v2043_v12  ;;  %vm591_vm15 = vcmp.eq.s32.totalorder %v494_v30, %v2043_v12  ;;  %v496_v5 = vadd.s32 240, %v1896_v35 }
 0x116   : > { %v1246_v10 = vpack.c.bf16 %v781_v13, %v716_v15  ;;  %vm597_vm1 = vcmp.eq.s32.totalorder %v497_v55, %v2043_v12 }
 0x117   : > { %v1245_v25 = vpack.c.bf16 %v779_v17, %v714_v61  ;;  %vm595_vm2 = vcmp.eq.s32.totalorder %v496_v5, %v2043_v12 }
 0x118   : > { %1009 = vst [vmem:[%s1966_s18 + $0xd8] sm:$0xff] %v1246_v10 }
 0x119   : > { %v1375_v22 = vpop.eup %1374  ;;  %1008 = vst [vmem:[%s1966_s18 + $0xd0] sm:$0xff] %v1245_v25 }
 0x11a   : > { %v1377_v63 = vpop.eup %1376  ;;  %461 = vst.msk [vmem:[%s1910_s6 + $0xe8] sm:$0xff] %vm431_vm0, %v1375_v22  ;;  %v657_v42 = vsel %vm593_vm14, %v1375_v22, 0.0  ;;  %v721_v53 = vmul.f32 %v1375_v22, %v2421_v8  ;;  %v720_v35 = vmul.f32 %v1375_v22, %v2423_v43 }
 0x11b   : > { %460 = vst.msk [vmem:[%s1910_s6 + $0xe0] sm:$0xff] %vm431_vm0, %v1377_v63  ;;  %v655_v44 = vsel %vm591_vm15, %v1377_v63, 0.0  ;;  %v719_v58 = vmul.f32 %v1377_v63, %v2422_v19  ;;  %v718_v59 = vmul.f32 %v1377_v63, %v2424_v7 }
 0x11c   : > { %v1379_v26 = vpop.eup %1378  ;;  %v785_v29 = vadd.f32 %v721_v53, %v657_v42 }
 0x11d   : > { %v783_v41 = vadd.f32 %v719_v58, %v655_v44  ;;  %463 = vst.msk [vmem:[%s1910_s6 + $0xf8] sm:$0xff] %vm431_vm0, %v1379_v26  ;;  %v661_v45 = vsel %vm597_vm1, %v1379_v26, 0.0  ;;  %v725_v40 = vmul.f32 %v1379_v26, %v2425_v56  ;;  %v724_v6 = vmul.f32 %v1379_v26, %v2426_v49 }
 0x11e   : > { %v1381_v18 = vpop.eup %1380  ;;  %v1248_v23 = vpack.c.bf16 %v785_v29, %v720_v35 }
 0x11f   : > { %v1247_v27 = vpack.c.bf16 %v783_v41, %v718_v59  ;;  %v789_v20 = vadd.f32 %v725_v40, %v661_v45  ;;  %462 = vst.msk [vmem:[%s1910_s6 + $0xf0] sm:$0xff] %vm431_vm0, %v1381_v18  ;;  %v659_v12 = vsel %vm595_vm2, %v1381_v18, 0.0  ;;  %v723_v11 = vmul.f32 %v1381_v18, %v2427_v16 }
 0x120   : > { %1011 = vst [vmem:[%s1966_s18 + $0xe8] sm:$0xff] %v1248_v23  ;;  %v722_v48 = vmul.f32 %v1381_v18, %v2428_v60 }
 0x121   : > { %1010 = vst [vmem:[%s1966_s18 + $0xe0] sm:$0xff] %v1247_v27  ;;  %v1250_v51 = vpack.c.bf16 %v789_v20, %v724_v6  ;;  %v787_v31 = vadd.f32 %v723_v11, %v659_v12 }
 0x123   : > { %1013 = vst [vmem:[%s1966_s18 + $0xf8] sm:$0xff] %v1250_v51  ;;  %v1249_v50 = vpack.c.bf16 %v787_v31, %v722_v48 }
 0x125   : > { %1012 = vst [vmem:[%s1966_s18 + $0xf0] sm:$0xff] %v1249_v50 }
 0x126   : > { %1425 = shalt.err (!%p1422_p4)
}
 0x127   : > { %s1426_s15 = scalar_lea.hbm %s2295_s27, 4096  ;;  %s1430_s4 = scalar_lea.hbm %s2349_s2, 8192 }
 0x128   : > { %p1427_p7 = scmp.ne.s32.totalorder %s2295_s27, %s1426_s15  ;;  %p1431_p1 = scmp.lt.u32.totalorder %s2295_s27, %s2349_s2 }
 0x129   : > { %p1432_p3 = scmp.lt.u32.totalorder %s1430_s4, %s1426_s15  ;;  %p1434_p9 = scmp.lt.u32.totalorder %s1426_s15, %s2295_s27 }
 0x12a   : > { %p1428_p10 = pnand %p1427_p7, %p2429_p11 }
 0x12b   : > { %p1433_p8 = por %p1432_p3, %p1431_p1 }
 0x12c   : > { %p1429_p12 = pneg %p1428_p10 }
 0x12d   : > { %p1435_p0 = por %p1434_p9, %p1433_p8 }
 0x12f   : > { %p1436_p6 = pnand %p1435_p0, %p1429_p12 }
 0x131   : > { %1439 = shalt.err (!%p1436_p6)
}
 0x132   : > { %s1500_s16 = smov 128   ;;  %s1501_s18 = smov 8  }
 0x133   : > { %1254 = dma.vmem_to_hbm [thread:$0]  (%p2429_p11), %s2297_s20, 4096, %s2295_s27, %s1024_s12, %s1500_s16, %s1500_s16, %s1501_s18  }
 0x134 PF: > { %s1071_s19 = sand.u32 1, %s1474_s9   ;;  %p2430_p13 = scmp.ne.s32.totalorder %s2378_s24, 0 }
 0x135   : > { %p2431_p2 = scmp.ge.s32.totalorder %s1494_s14, 2  ;;  %s1072_s25 = scalar_lea.sflag [#allocation4], %s1071_s19 }
 0x137   : > { %p1261_p5 = pnand %p2431_p2, %p2430_p13 }
 0x139   : > { %1469 = dma.done.wait (!%p1261_p5), %s1072_s25, 4096  }
 0x13a   : > { %1471 = vsyncadd (!%p1261_p5), %s1072_s25, 4294963200  ;;  %s19_s14 = sadd.s32 1, %s1494_s14   ;;  %s2432_s9 = smov %s1478_s10 }
 0x13b   : > { %p16_p4 = scmp.ge.s32.totalorder %s19_s14, 4   ;;  %s2433_s10 = smov %s1482_s11 }
 0x13c   : > { %s2434_s11 = smov %s1573_s23  ;;  %s2435_s12 = smov %s1490_s13 }
 0x13d   : > { %s2436_s13 = smov %s2438_s17  ;;  %18 = sbr.rel (!%p16_p4) target bundleno = 6 (0x6), region = 81 }
 0x144   :  { %1077 = vsyncpa [#allocation3], 1 }
 0x145   :  { %1079 = vsyncpa [#allocation3 + $0x1], 1 }
 0x146   :  { %1080 = vsyncpa [#allocation4], 1 }
 0x147   :  { %1082 = vsyncpa [#allocation4 + $0x1], 1 }

</bundles_post_ra>
